<compile_context>
chip_gen: v6e
topology: v6e:2x2x1
jax: 0.10.0
libtpu: 0.0.40
codegen_flags: <defaults>
</compile_context>

<pallas_src>
import jax
import jax.numpy as jnp
from jax import lax
from jax.experimental import pallas as pl
from jax.experimental.pallas import tpu as pltpu

# ----- model hyper-parameters (mirrors DeepCMHETorch.__init__) -----
K = 3           # number of latent Cox experts
G = 3           # number of treatment-effect phenogroups
INPUTDIM = 16
LAYERS = [32]   # create_representation(inputdim, layers, 'Tanh'), bias=False
GAMMA = 100.0
N = 8           # demo batch size


def _log_softmax_rows(logits, rows):
    """Stable log-softmax across `rows` sublanes of a [rows, bm] tile.

    Explicit per-row max / sum over a tiny static sublane count; every
    operation is full-128-lane dense (batch lives on the lane axis).
    """
    m = logits[0:1, :]
    for r in range(1, rows):
        m = jnp.maximum(m, logits[r:r + 1, :])
    shifted = logits - m
    e = jnp.exp(shifted)
    s = e[0:1, :]
    for r in range(1, rows):
        s = s + e[r:r + 1, :]
    return shifted - jnp.log(s)


def cmhe_kernel(x_ref, a_ref, w_emb_t_ref, w_heads_t_ref, omega_ref,
                gate_ref, hrs_ref):
    # x_ref:        [bm, D]   batch-major in HBM (lane padding only in VMEM)
    # a_ref:        [1, bm]   lane-dense treatment indicator
    # w_emb_t_ref:  [H, D]    resident, transposed embedding weight
    # w_heads_t_ref:[2K+G, H] resident, transposed fused heads (expert|z|phi)
    # omega_ref:    [G, 1]    resident, (j != 2)-masked omega
    # gate_ref:     [K*G, bm] feature-major output (row = i*G + j)
    # hrs_ref:      [K*G, bm] feature-major output (row = i*G + j)

    # h_T[f, n] = tanh(sum_d W_emb[d, f] * x[n, d])  -> [H, bm]
    # (same contraction pattern as q @ k.T: both operands contracted on their
    #  last dim; MXU handles the transposed RHS.)
    h_t = jnp.tanh(
        lax.dot_general(
            w_emb_t_ref[...], x_ref[...],
            dimension_numbers=(((1,), (1,)), ((), ())),
            preferred_element_type=jnp.float32))

    # Fused heads in one MXU pass: rows 0..K-1 = expert, K..2K-1 = z_gate,
    # 2K..2K+G-1 = phi_gate.
    logits_t = jnp.dot(w_heads_t_ref[...], h_t,
                       preferred_element_type=jnp.float32)      # [2K+G, bm]

    log_hrs = jnp.clip(logits_t[0:K, :], -GAMMA, GAMMA)          # [K, bm]
    logp_z = _log_softmax_rows(logits_t[K:2 * K, :], K)          # [K, bm]
    logp_phi = _log_softmax_rows(logits_t[2 * K:2 * K + G, :], G)  # [G, bm]

    # a in {0,1} -> {-1,+1}; omega already carries the hardcoded (j != 2)
    # control-group mask (folded in the wrapper, mirroring the torch code).
    a_om = (2.0 * a_ref[...] - 1.0) * omega_ref[...]             # [G, bm]

    # Direct static-slice stores (no concatenate temp), all lane-dense:
    #   gate[i*G + j, :] = logp_z[i, :] + logp_phi[j, :]
    #   hrs [i*G + j, :] = log_hrs[i, :] + a2 * omega_eff[j]
    for i in range(K):
        gate_ref[i * G:(i + 1) * G, :] = logp_z[i:i + 1, :] + logp_phi
        hrs_ref[i * G:(i + 1) * G, :] = log_hrs[i:i + 1, :] + a_om


def _choose_block_m(n, block_m):
    """Row block: as large as possible (amortize per-step overhead), a multiple
    of 128 whenever it does not cover the whole batch (lane tiling), and >= 2
    grid steps for big batches so v7x's two TensorCores both get work under
    dimension_semantics=("parallel",).  On single-TC v5e/v6e the extra step is
    noise once each step covers >= ~1k rows."""
    cap = max(128, min(int(block_m), 8192))
    if n <= cap:
        if n >= 2048:
            half = (((n + 1) // 2) + 127) // 128 * 128
            if half < n:
                return half
        return n
    return (cap // 128) * 128


def deep_cmhe_forward(x, a, w_emb, w_expert, w_zgate, w_phigate, omega,
                      *, block_m=4096):
    n, d = x.shape
    hidden = w_emb.shape[-1]
    nheads = 2 * K + G
    kg = K * G

    # Tiny resident weights, pre-transposed to feature-major (negligible cost).
    w_emb_t = jnp.asarray(w_emb, jnp.float32).T                       # [H, D]
    w_heads_t = jnp.concatenate([w_expert, w_zgate, w_phigate],
                                axis=1).astype(jnp.float32).T         # [2K+G, H]

    # Constant-fold the module's hardcoded (j != 2) control-group mask into
    # omega.  NOTE: DeepCMHETorch.forward hardcodes phenogroup index 2
    # regardless of g -- we mirror that exactly (guarded by this comment).
    omega_col = (jnp.asarray(omega, jnp.float32)
                 * (jnp.arange(G) != 2).astype(jnp.float32)).reshape(G, 1)

    # Treatment indicator as a lane-dense [1, N] row (free reshape, no 1->128
    # lane padding in VMEM, single tiny DMA stream).
    a_row = jnp.asarray(a, jnp.float32).reshape(1, n)

    bm = _choose_block_m(n, block_m)
    grid = (pl.cdiv(n, bm),)   # ragged tail handled by Pallas edge masking

    gate_t, hrs_t = pl.pallas_call(
        cmhe_kernel,
        out_shape=(jax.ShapeDtypeStruct((kg, n), jnp.float32),
                   jax.ShapeDtypeStruct((kg, n), jnp.float32)),
        grid=grid,
        in_specs=[
            pl.BlockSpec((bm, d), lambda i: (i, 0)),            # x rows
            pl.BlockSpec((1, bm), lambda i: (0, i)),            # a (lane-dense)
            pl.BlockSpec((hidden, d), lambda i: (0, 0)),        # resident W_emb^T
            pl.BlockSpec((nheads, hidden), lambda i: (0, 0)),   # resident heads^T
            pl.BlockSpec((G, 1), lambda i: (0, 0)),             # resident omega_eff
        ],
        out_specs=(pl.BlockSpec((kg, bm), lambda i: (0, i)),
                   pl.BlockSpec((kg, bm), lambda i: (0, i))),
        compiler_params=pltpu.CompilerParams(
            dimension_semantics=("parallel",),
            vmem_limit_bytes=32 * 1024 * 1024),
    )(x.astype(jnp.float32), a_row, w_emb_t, w_heads_t, omega_col)

    # Feature-major -> (N, K, G).  Layout plumbing outside the kernel.
    gate = gate_t.T.reshape(n, K, G)
    hrs = hrs_t.T.reshape(n, K, G)
    return gate, hrs


def reference_forward(x, a, w_emb, w_expert, w_zgate, w_phigate, omega):
    # Pure-JAX float32 reference (HIGHEST matmul precision = the f32 PyTorch
    # ground truth).  The kernel is also f32; the comparison tolerance below
    # only needs to absorb possible MXU f32 pass-count differences.
    hp = lax.Precision.HIGHEST
    h = jnp.tanh(jnp.dot(x, w_emb, precision=hp))
    log_hrs = jnp.clip(jnp.dot(h, w_expert, precision=hp), -GAMMA, GAMMA)
    logp_z = jax.nn.log_softmax(jnp.dot(h, w_zgate, precision=hp), axis=1)
    logp_phi = jax.nn.log_softmax(jnp.dot(h, w_phigate, precision=hp), axis=1)
    a2 = 2.0 * (a - 0.5)
    gate = logp_z[:, :, None] + logp_phi[:, None, :]
    j = jnp.arange(G)
    hrs = (log_hrs[:, :, None]
           + ((j != 2).astype(jnp.float32) * omega)[None, None, :]
           * a2[:, None, None])
    return gate, hrs


if __name__ == "__main__":
    key = jax.random.PRNGKey(0)
    kx, ka, k1, k2, k3, k4, k5, kx2, ka2 = jax.random.split(key, 9)

    # deterministic synthetic parameters (shapes from __init__)
    hidden = LAYERS[-1]
    w_emb = jax.random.normal(k1, (INPUTDIM, hidden), jnp.float32) * 0.1
    w_expert = jax.random.normal(k2, (hidden, K), jnp.float32) * 0.1
    w_zgate = jax.random.normal(k3, (hidden, K), jnp.float32) * 0.1
    w_phigate = jax.random.normal(k4, (hidden, G), jnp.float32) * 0.1
    omega = jax.random.uniform(k5, (G,), jnp.float32) - 0.5   # torch.rand(g) - 0.5

    # ---- small batch (single grid step, block == whole batch) ----
    x = jax.random.normal(kx, (N, INPUTDIM), jnp.float32)
    a = jax.random.bernoulli(ka, 0.5, (N,)).astype(jnp.float32)

    gate, hrs = deep_cmhe_forward(x, a, w_emb, w_expert, w_zgate, w_phigate, omega)
    jax.block_until_ready((gate, hrs))

    gate_ref, hrs_ref = reference_forward(x, a, w_emb, w_expert, w_zgate,
                                          w_phigate, omega)
    assert gate.shape == (N, K, G) and hrs.shape == (N, K, G)
    assert jnp.allclose(gate, gate_ref, atol=1e-2, rtol=1e-2)
    assert jnp.allclose(hrs, hrs_ref, atol=1e-2, rtol=1e-2)

    # ---- larger batch: multiple grid steps + ragged (masked) tail block ----
    n2 = 3000
    x2 = jax.random.normal(kx2, (n2, INPUTDIM), jnp.float32)
    a2 = jax.random.bernoulli(ka2, 0.5, (n2,)).astype(jnp.float32)
    gate2, hrs2 = deep_cmhe_forward(x2, a2, w_emb, w_expert, w_zgate,
                                    w_phigate, omega)
    jax.block_until_ready((gate2, hrs2))
    gate2_ref, hrs2_ref = reference_forward(x2, a2, w_emb, w_expert, w_zgate,
                                            w_phigate, omega)
    assert jnp.allclose(gate2, gate2_ref, atol=1e-2, rtol=1e-2)
    assert jnp.allclose(hrs2, hrs2_ref, atol=1e-2, rtol=1e-2)

    print("KERNEL_OK")
</pallas_src>

<mosaic_0001>
module attributes {stable_mosaic.version = 11 : i64} {
  func.func @cmhe_kernel(%arg0: i32, %arg1: memref<8x16xf32, #tpu.memory_space<vmem>>, %arg2: memref<1x8xf32, #tpu.memory_space<vmem>>, %arg3: memref<32x16xf32, #tpu.memory_space<vmem>>, %arg4: memref<9x32xf32, #tpu.memory_space<vmem>>, %arg5: memref<3x1xf32, #tpu.memory_space<vmem>>, %arg6: memref<9x8xf32, #tpu.memory_space<vmem>>, %arg7: memref<9x8xf32, #tpu.memory_space<vmem>>) attributes {dimension_semantics = [#tpu.dimension_semantics<parallel>], iteration_bounds = array<i64: 1>, scalar_prefetch = 0 : i64, scratch_operands = 0 : i64, tpu.core_type = #tpu.core_type<tc>, window_params = [{transform_indices = @transform_0, window_bounds = array<i64: 8, 16>}, {transform_indices = @transform_1, window_bounds = array<i64: 1, 8>}, {pipeline_mode = #tpu.pipeline_mode<synchronous>, transform_indices = @transform_2, window_bounds = array<i64: 32, 16>}, {pipeline_mode = #tpu.pipeline_mode<synchronous>, transform_indices = @transform_3, window_bounds = array<i64: 9, 32>}, {pipeline_mode = #tpu.pipeline_mode<synchronous>, transform_indices = @transform_4, window_bounds = array<i64: 3, 1>}, {transform_indices = @transform_5, window_bounds = array<i64: 9, 8>}, {transform_indices = @transform_6, window_bounds = array<i64: 9, 8>}]} {
    %c0 = arith.constant 0 : index
    %c0_0 = arith.constant 0 : index
    %0 = vector.load %arg3[%c0, %c0_0] : memref<32x16xf32, #tpu.memory_space<vmem>>, vector<32x16xf32>
    %c0_1 = arith.constant 0 : index
    %c0_2 = arith.constant 0 : index
    %1 = vector.load %arg1[%c0_1, %c0_2] : memref<8x16xf32, #tpu.memory_space<vmem>>, vector<8x16xf32>
    %cst = arith.constant dense<0.000000e+00> : vector<32x8xf32>
    %2 = tpu.matmul %0, %1, %cst {dimension_numbers = #tpu.dot_dimension_numbers<[1], [1], [0], [0], [0, 0, 1, 0], [], []>} : vector<32x16xf32>, vector<8x16xf32>, vector<32x8xf32> -> vector<32x8xf32>
    %3 = math.tanh %2 : vector<32x8xf32>
    %c0_3 = arith.constant 0 : index
    %c0_4 = arith.constant 0 : index
    %4 = vector.load %arg4[%c0_3, %c0_4] : memref<9x32xf32, #tpu.memory_space<vmem>>, vector<9x32xf32>
    %cst_5 = arith.constant dense<0.000000e+00> : vector<9x8xf32>
    %5 = tpu.matmul %4, %3, %cst_5 {dimension_numbers = #tpu.dot_dimension_numbers<[1], [0], [0], [1], [0, 0, 1, 1], [], []>} : vector<9x32xf32>, vector<32x8xf32>, vector<9x8xf32> -> vector<9x8xf32>
    %6 = vector.extract_strided_slice %5 {offsets = [0, 0], sizes = [3, 8], strides = [1, 1]} : vector<9x8xf32> to vector<3x8xf32>
    %cst_6 = arith.constant -1.000000e+02 : f32
    %cst_7 = arith.constant 1.000000e+02 : f32
    %7 = vector.broadcast %cst_6 : f32 to vector<3x8xf32>
    %8 = arith.maximumf %7, %6 : vector<3x8xf32>
    %9 = vector.broadcast %cst_7 : f32 to vector<3x8xf32>
    %10 = arith.minimumf %9, %8 : vector<3x8xf32>
    %11 = vector.extract_strided_slice %5 {offsets = [3, 0], sizes = [3, 8], strides = [1, 1]} : vector<9x8xf32> to vector<3x8xf32>
    %12 = vector.extract_strided_slice %11 {offsets = [0, 0], sizes = [1, 8], strides = [1, 1]} : vector<3x8xf32> to vector<1x8xf32>
    %13 = vector.extract_strided_slice %11 {offsets = [1, 0], sizes = [1, 8], strides = [1, 1]} : vector<3x8xf32> to vector<1x8xf32>
    %14 = arith.maximumf %12, %13 : vector<1x8xf32>
    %15 = vector.extract_strided_slice %11 {offsets = [2, 0], sizes = [1, 8], strides = [1, 1]} : vector<3x8xf32> to vector<1x8xf32>
    %16 = arith.maximumf %14, %15 : vector<1x8xf32>
    %17 = vector.broadcast %16 : vector<1x8xf32> to vector<3x8xf32>
    %18 = arith.subf %11, %17 : vector<3x8xf32>
    %19 = math.exp %18 : vector<3x8xf32>
    %20 = vector.extract_strided_slice %19 {offsets = [0, 0], sizes = [1, 8], strides = [1, 1]} : vector<3x8xf32> to vector<1x8xf32>
    %21 = vector.extract_strided_slice %19 {offsets = [1, 0], sizes = [1, 8], strides = [1, 1]} : vector<3x8xf32> to vector<1x8xf32>
    %22 = arith.addf %20, %21 : vector<1x8xf32>
    %23 = vector.extract_strided_slice %19 {offsets = [2, 0], sizes = [1, 8], strides = [1, 1]} : vector<3x8xf32> to vector<1x8xf32>
    %24 = arith.addf %22, %23 : vector<1x8xf32>
    %25 = math.log %24 : vector<1x8xf32>
    %26 = vector.broadcast %25 : vector<1x8xf32> to vector<3x8xf32>
    %27 = arith.subf %18, %26 : vector<3x8xf32>
    %28 = vector.extract_strided_slice %5 {offsets = [6, 0], sizes = [3, 8], strides = [1, 1]} : vector<9x8xf32> to vector<3x8xf32>
    %29 = vector.extract_strided_slice %28 {offsets = [0, 0], sizes = [1, 8], strides = [1, 1]} : vector<3x8xf32> to vector<1x8xf32>
    %30 = vector.extract_strided_slice %28 {offsets = [1, 0], sizes = [1, 8], strides = [1, 1]} : vector<3x8xf32> to vector<1x8xf32>
    %31 = arith.maximumf %29, %30 : vector<1x8xf32>
    %32 = vector.extract_strided_slice %28 {offsets = [2, 0], sizes = [1, 8], strides = [1, 1]} : vector<3x8xf32> to vector<1x8xf32>
    %33 = arith.maximumf %31, %32 : vector<1x8xf32>
    %34 = vector.broadcast %33 : vector<1x8xf32> to vector<3x8xf32>
    %35 = arith.subf %28, %34 : vector<3x8xf32>
    %36 = math.exp %35 : vector<3x8xf32>
    %37 = vector.extract_strided_slice %36 {offsets = [0, 0], sizes = [1, 8], strides = [1, 1]} : vector<3x8xf32> to vector<1x8xf32>
    %38 = vector.extract_strided_slice %36 {offsets = [1, 0], sizes = [1, 8], strides = [1, 1]} : vector<3x8xf32> to vector<1x8xf32>
    %39 = arith.addf %37, %38 : vector<1x8xf32>
    %40 = vector.extract_strided_slice %36 {offsets = [2, 0], sizes = [1, 8], strides = [1, 1]} : vector<3x8xf32> to vector<1x8xf32>
    %41 = arith.addf %39, %40 : vector<1x8xf32>
    %42 = math.log %41 : vector<1x8xf32>
    %43 = vector.broadcast %42 : vector<1x8xf32> to vector<3x8xf32>
    %44 = arith.subf %35, %43 : vector<3x8xf32>
    %c0_8 = arith.constant 0 : index
    %c0_9 = arith.constant 0 : index
    %45 = vector.load %arg2[%c0_8, %c0_9] : memref<1x8xf32, #tpu.memory_space<vmem>>, vector<1x8xf32>
    %cst_10 = arith.constant 2.000000e+00 : f32
    %46 = vector.broadcast %cst_10 : f32 to vector<1x8xf32>
    %47 = arith.mulf %46, %45 : vector<1x8xf32>
    %cst_11 = arith.constant 1.000000e+00 : f32
    %48 = vector.broadcast %cst_11 : f32 to vector<1x8xf32>
    %49 = arith.subf %47, %48 : vector<1x8xf32>
    %c0_12 = arith.constant 0 : index
    %c0_13 = arith.constant 0 : index
    %50 = vector.load %arg5[%c0_12, %c0_13] : memref<3x1xf32, #tpu.memory_space<vmem>>, vector<3x1xf32>
    %51 = vector.broadcast %49 : vector<1x8xf32> to vector<3x8xf32>
    %52 = vector.broadcast %50 : vector<3x1xf32> to vector<3x8xf32>
    %53 = arith.mulf %51, %52 : vector<3x8xf32>
    %54 = vector.extract_strided_slice %27 {offsets = [0, 0], sizes = [1, 8], strides = [1, 1]} : vector<3x8xf32> to vector<1x8xf32>
    %55 = vector.broadcast %54 : vector<1x8xf32> to vector<3x8xf32>
    %56 = arith.addf %55, %44 : vector<3x8xf32>
    %c0_14 = arith.constant 0 : index
    %c0_15 = arith.constant 0 : index
    %57 = vector.load %arg6[%c0_14, %c0_15] : memref<9x8xf32, #tpu.memory_space<vmem>>, vector<3x8xf32>
    tpu.vector_store %arg6[%c0_14, %c0_15], %56 {strides = array<i32>} : memref<9x8xf32, #tpu.memory_space<vmem>>, vector<3x8xf32>,
    %58 = vector.extract_strided_slice %10 {offsets = [0, 0], sizes = [1, 8], strides = [1, 1]} : vector<3x8xf32> to vector<1x8xf32>
    %59 = vector.broadcast %58 : vector<1x8xf32> to vector<3x8xf32>
    %60 = arith.addf %59, %53 : vector<3x8xf32>
    %c0_16 = arith.constant 0 : index
    %c0_17 = arith.constant 0 : index
    %61 = vector.load %arg7[%c0_16, %c0_17] : memref<9x8xf32, #tpu.memory_space<vmem>>, vector<3x8xf32>
    tpu.vector_store %arg7[%c0_16, %c0_17], %60 {strides = array<i32>} : memref<9x8xf32, #tpu.memory_space<vmem>>, vector<3x8xf32>,
    %62 = vector.extract_strided_slice %27 {offsets = [1, 0], sizes = [1, 8], strides = [1, 1]} : vector<3x8xf32> to vector<1x8xf32>
    %63 = vector.broadcast %62 : vector<1x8xf32> to vector<3x8xf32>
    %64 = arith.addf %63, %44 : vector<3x8xf32>
    %c3 = arith.constant 3 : index
    %c0_18 = arith.constant 0 : index
    %65 = vector.load %arg6[%c3, %c0_18] : memref<9x8xf32, #tpu.memory_space<vmem>>, vector<3x8xf32>
    tpu.vector_store %arg6[%c3, %c0_18], %64 {strides = array<i32>} : memref<9x8xf32, #tpu.memory_space<vmem>>, vector<3x8xf32>,
    %66 = vector.extract_strided_slice %10 {offsets = [1, 0], sizes = [1, 8], strides = [1, 1]} : vector<3x8xf32> to vector<1x8xf32>
    %67 = vector.broadcast %66 : vector<1x8xf32> to vector<3x8xf32>
    %68 = arith.addf %67, %53 : vector<3x8xf32>
    %c3_19 = arith.constant 3 : index
    %c0_20 = arith.constant 0 : index
    %69 = vector.load %arg7[%c3_19, %c0_20] : memref<9x8xf32, #tpu.memory_space<vmem>>, vector<3x8xf32>
    tpu.vector_store %arg7[%c3_19, %c0_20], %68 {strides = array<i32>} : memref<9x8xf32, #tpu.memory_space<vmem>>, vector<3x8xf32>,
    %70 = vector.extract_strided_slice %27 {offsets = [2, 0], sizes = [1, 8], strides = [1, 1]} : vector<3x8xf32> to vector<1x8xf32>
    %71 = vector.broadcast %70 : vector<1x8xf32> to vector<3x8xf32>
    %72 = arith.addf %71, %44 : vector<3x8xf32>
    %c6 = arith.constant 6 : index
    %c0_21 = arith.constant 0 : index
    %73 = vector.load %arg6[%c6, %c0_21] : memref<9x8xf32, #tpu.memory_space<vmem>>, vector<3x8xf32>
    tpu.vector_store %arg6[%c6, %c0_21], %72 {strides = array<i32>} : memref<9x8xf32, #tpu.memory_space<vmem>>, vector<3x8xf32>,
    %74 = vector.extract_strided_slice %10 {offsets = [2, 0], sizes = [1, 8], strides = [1, 1]} : vector<3x8xf32> to vector<1x8xf32>
    %75 = vector.broadcast %74 : vector<1x8xf32> to vector<3x8xf32>
    %76 = arith.addf %75, %53 : vector<3x8xf32>
    %c6_22 = arith.constant 6 : index
    %c0_23 = arith.constant 0 : index
    %77 = vector.load %arg7[%c6_22, %c0_23] : memref<9x8xf32, #tpu.memory_space<vmem>>, vector<3x8xf32>
    tpu.vector_store %arg7[%c6_22, %c0_23], %76 {strides = array<i32>} : memref<9x8xf32, #tpu.memory_space<vmem>>, vector<3x8xf32>,
    return
  }
  func.func @transform_0(%arg0: i32) -> (i32, i32) {
    %c0_i32 = arith.constant 0 : i32
    %c0_i32_0 = arith.constant 0 : i32
    return %arg0, %c0_i32 : i32, i32
  }
  func.func @transform_1(%arg0: i32) -> (i32, i32) {
    %c0_i32 = arith.constant 0 : i32
    %c0_i32_0 = arith.constant 0 : i32
    return %c0_i32, %arg0 : i32, i32
  }
  func.func @transform_2(%arg0: i32) -> (i32, i32) {
    %c0_i32 = arith.constant 0 : i32
    %c0_i32_0 = arith.constant 0 : i32
    %c0_i32_1 = arith.constant 0 : i32
    return %c0_i32, %c0_i32_0 : i32, i32
  }
  func.func @transform_3(%arg0: i32) -> (i32, i32) {
    %c0_i32 = arith.constant 0 : i32
    %c0_i32_0 = arith.constant 0 : i32
    %c0_i32_1 = arith.constant 0 : i32
    return %c0_i32, %c0_i32_0 : i32, i32
  }
  func.func @transform_4(%arg0: i32) -> (i32, i32) {
    %c0_i32 = arith.constant 0 : i32
    %c0_i32_0 = arith.constant 0 : i32
    %c0_i32_1 = arith.constant 0 : i32
    return %c0_i32, %c0_i32_0 : i32, i32
  }
  func.func @transform_5(%arg0: i32) -> (i32, i32) {
    %c0_i32 = arith.constant 0 : i32
    %c0_i32_0 = arith.constant 0 : i32
    return %c0_i32, %arg0 : i32, i32
  }
  func.func @transform_6(%arg0: i32) -> (i32, i32) {
    %c0_i32 = arith.constant 0 : i32
    %c0_i32_0 = arith.constant 0 : i32
    return %c0_i32, %arg0 : i32, i32
  }
}

</mosaic_0001>

<bundles_post_ra>
// kernel: tpu_custom_call.1
= control target key start
LH: loop header
LB: loop body
LE: loop exit
PB: predicated region body
PF: predicated region fallthrough
CT: control target
= control target key end

     0   :  { %vm27_vm0 = vcmask 130048   ;;  %vm134_vm1 = vcmask 261120   ;;  %v404_v6 = vmov 0   ;;  %v225_v17 = vlaneseq  ;;  %s505_s0 = inlined_call_operand.vmem [shape: f32[8,16], index: 0, kind: input, shape index: {}]   ;;  %s506_s2 = inlined_call_operand.vmem [shape: f32[32,16], index: 2, kind: input, shape index: {}]   ;;  %s507_s3 = inlined_call_operand.vmem [shape: f32[9,32], index: 3, kind: input, shape index: {}]   ;;  %s508_s4 = inlined_call_operand.vmem [shape: f32[3,1], index: 4, kind: input, shape index: {}]   ;;  %s509_s1 = inlined_call_operand.vmem [shape: f32[1,8], index: 1, kind: input, shape index: {}]   ;;  %s510_s6 = inlined_call_operand.vmem [shape: f32[9,8], index: 6, kind: output, shape index: {1}]   ;;  %s511_s5 = inlined_call_operand.vmem [shape: f32[9,8], index: 5, kind: output, shape index: {0}]  }
   0x1   :  { %v26_v0 = vld [vmem:[%s505_s0] sm:$0xff]  ;;  %v23_v2 = vld [vmem:[%s506_s2 + $0x8] sm:$0xff]  ;;  %v24_v3 = vld [vmem:[%s506_s2 + $0x10] sm:$0xff]  ;;  %385 = vset.pattern.permute.xlu0 %v404_v6  ;;  %vm307_vm2 = vcmask 59392   ;;  %vm298_vm3 = vcmask 64518   ;;  %vm300_vm4 = vcmask 57344  }
   0x2   :  { %v22_v1 = vld [vmem:[%s506_s2] sm:$0xff]  ;;  %365 = vmatprep.subr.msk.mxu0 %vm27_vm0, %v26_v0  ;;  %v25_v4 = vld [vmem:[%s506_s2 + $0x18] sm:$0xff]  ;;  %v133_v16 = vld [vmem:[%s507_s3 + $0x8] sm:$0x1]  ;;  %v469_v19 = vshrl.u32 %v225_v17, 7 }
   0x3   :  { %367 = vmatprep.mubr.msk.f32.mxu0 %vm27_vm0, %v22_v1  ;;  %366 = vmatpush3.xpose.msk.msra.mxu0 %vm27_vm0, %v26_v0  ;;  %v132_v5 = vld [vmem:[%s507_s3] sm:$0xff] }
   0x4   :  { %381 = vmatprep.mubr.msk.f32.mxu1 %vm134_vm1, %v132_v5  ;;  %v279_v7 = vld [vmem:[%s508_s4] sm:$0x7]  ;;  %v283_v21 = vsub.s32 0, %v469_v19  ;;  %v319_v26 = vsub.s32 1, %v469_v19  ;;  %v333_v27 = vsub.s32 2, %v469_v19  ;;  %v227_v34 = vsub.s32 3, %v469_v19 }
   0x5   :  { %288 = vperm.xlu0 %385, %v279_v7   ;;  %v276_v18 = vld [vmem:[%s509_s1] sm:$0x1]  ;;  %v252_v35 = vsub.s32 6, %v469_v19  ;;  %v311_v5 = vsub.s32 4, %v469_v19  ;;  %v325_v6 = vsub.s32 5, %v469_v19 }
   0x6   :  { %368 = vmatmul.mubr.msk.f32.vlgmr.msra.gmra.mxu0 %vm27_vm0, %v23_v2  ;;  %v277_v20 = vmul.f32 2.0, %v276_v18 }
   0x7   :  { %370 = vmatprep.mubr.msk.f32.mxu0 %vm27_vm0, %v24_v3 }
   0x8   :  { %v353_v22 = vadd.f32 -1.0, %v277_v20 }
   0xa   :  { %371 = vmatmul.mubr.msk.f32.gmra.mxu0 %vm27_vm0, %v25_v4  ;;  %v284_v23 = vrot.slane %v353_v22, %v283_v21 }
  0x80   :  { %v289_v25 = vpop.permute.xlu0 %288 }
  0x81   :  { %v291_v31 = vmul.f32 %v289_v25, %v284_v23 }
  0xc6   :  { %v369_v8 = vpop.f32.mrf.mxu0 }
  0xc8   :  { %v109_v9 = vpop.f32.mrf.mxu0 }
  0xca   :  { %v372_v10 = vpop.f32.mrf.mxu0 }
  0xcb   :  { %386 = vtanh.f32 %v372_v10 }
  0xcc   :  { %v119_v11 = vpop.f32.mrf.mxu0 }
  0xcd   :  { %388 = vtanh.f32 %v119_v11 }
  0xce   :  { %390 = vtanh.f32 %v369_v8 }
  0xcf   :  { %392 = vtanh.f32 %v109_v9 }
  0xd8   :  { %v387_v12 = vpop.eup %386 }
  0xd9   :  { %373 = vmatprep.subr.mxu1 %v387_v12 }
  0xda   :  { %v389_v13 = vpop.eup %388  ;;  %374 = vmatpush3.msra.mxu1 %v387_v12 }
  0xdb   :  { %375 = vmatprep.subr.mxu1 %v389_v13  ;;  %v391_v14 = vpop.eup %390 }
  0xdc   :  { %376 = vmatpush3.msra.mxu1 %v389_v13  ;;  %v393_v15 = vpop.eup %392 }
  0xdd   :  { %377 = vmatprep.subr.mxu1 %v391_v14 }
  0xde   :  { %378 = vmatpush3.msra.mxu1 %v391_v14 }
  0xdf   :  { %379 = vmatprep.subr.mxu1 %v393_v15 }
  0xe0   :  { %380 = vmatpush3.msra.mxu1 %v393_v15 }
  0xe1   :  { %382 = vmatmul.mubr.msk.f32.vlgmr.msra.gmra.mxu1 %vm134_vm1, %v133_v16 }
 0x1a1   :  { %v383_v24 = vpop.f32.mrf.mxu1 }
 0x1a2   :  { %v247_v32 = vrot.slane %v383_v24, 2 }
 0x1a3   :  { %v207_v28 = vpop.f32.mrf.mxu1 }
 0x1a4   :  { %v352_v29 = vclamps-f32 %v207_v28, 100.0  ;;  %v219_v30 = vrot.slane %v207_v28, 1  ;;  %v222_v33 = vrot.slane %v207_v28, 2 }
 0x1a6   :  { %v221_v36 = vmax.f32 %v207_v28, %v219_v30  ;;  %v305_v37 = vrot.slane %v352_v29, %v283_v21  ;;  %v320_v38 = vrot.slane %v352_v29, %v319_v26  ;;  %v334_v39 = vrot.slane %v352_v29, %v333_v27 }
 0x1a8   :  { %v224_v40 = vmax.f32 %v221_v36, %v222_v33  ;;  %v249_v41 = vmax.f32 %v221_v36, %v247_v32  ;;  %v306_v42 = vadd.f32 %v305_v37, %v291_v31  ;;  %v321_v43 = vadd.f32 %v320_v38, %v291_v31 }
 0x1a9   :  { %v335_v44 = vadd.f32 %v334_v39, %v291_v31 }
 0x1aa   :  { %v228_v45 = vrot.slane %v224_v40, %v227_v34  ;;  %v253_v46 = vrot.slane %v249_v41, %v252_v35  ;;  %308 = vst.msk [vmem:[%s510_s6] sm:$0x7] %vm307_vm2, %v306_v42  ;;  %322 = vst.msk [vmem:[%s510_s6 + $0x3] sm:$0x7] %vm307_vm2, %v321_v43 }
 0x1ab   :  { %336 = vst.msk [vmem:[%s510_s6 + $0x6] sm:$0x7] %vm307_vm2, %v335_v44 }
 0x1ac   :  { %v229_v47 = vsub.f32 %v207_v28, %v228_v45  ;;  %v254_v48 = vsub.f32 %v207_v28, %v253_v46  ;;  %v255_v49 = vsub.f32 %v383_v24, %v253_v46 }
 0x1ae   :  { %v230_v50 = vmul.f32 1.442695, %v229_v47  ;;  %v256_v51 = vmul.f32 1.442695, %v254_v48  ;;  %v258_v52 = vmul.f32 1.442695, %v255_v49 }
 0x1b0   :  { %394 = vpow2.f32 %v230_v50 }
 0x1b1   :  { %396 = vpow2.f32 %v256_v51 }
 0x1b2   :  { %398 = vpow2.f32 %v258_v52 }
 0x1bd   :  { %v395_v53 = vpop.eup %394 }
 0x1be   :  { %v397_v54 = vpop.eup %396  ;;  %v233_v55 = vrot.slane %v395_v53, 1  ;;  %v236_v59 = vrot.slane %v395_v53, 2 }
 0x1bf   :  { %v399_v56 = vpop.eup %398  ;;  %v261_v57 = vrot.slane %v397_v54, 1 }
 0x1c0   :  { %v235_v58 = vadd.f32 %v395_v53, %v233_v55  ;;  %v265_v61 = vrot.slane %v399_v56, 2 }
 0x1c1   :  { %v263_v60 = vadd.f32 %v397_v54, %v261_v57 }
 0x1c2   :  { %v238_v62 = vadd.f32 %v236_v59, %v235_v58 }
 0x1c3   :  { %v267_v63 = vadd.f32 %v265_v61, %v263_v60 }
 0x1c4   :  { %400 = vlog2.f32 %v238_v62 }
 0x1c5   :  { %402 = vlog2.f32 %v267_v63 }
 0x1d1   :  { %v401_v0 = vpop.eup %400 }
 0x1d2   :  { %v403_v1 = vpop.eup %402  ;;  %v240_v2 = vmul.f32 0.6931472, %v401_v0 }
 0x1d3   :  { %v269_v3 = vmul.f32 0.6931472, %v403_v1 }
 0x1d4   :  { %v244_v4 = vrot.slane %v240_v2, %v227_v34 }
 0x1d5   :  { %v273_v7 = vrot.slane %v269_v3, %v252_v35 }
 0x1d6   :  { %v245_v8 = vsub.f32 %v229_v47, %v244_v4 }
 0x1d7   :  { %v274_v9 = vsub.f32 %v254_v48, %v273_v7  ;;  %v275_v10 = vsub.f32 %v255_v49, %v273_v7 }
 0x1d8   :  { %v295_v11 = vrot.slane %v245_v8, %v227_v34  ;;  %v312_v12 = vrot.slane %v245_v8, %v311_v5  ;;  %v326_v13 = vrot.slane %v245_v8, %v325_v6 }
 0x1da   :  { %v296_v14 = vadd.f32 %v295_v11, %v274_v9  ;;  %v297_v15 = vadd.f32 %v295_v11, %v275_v10  ;;  %v313_v16 = vadd.f32 %v312_v12, %v274_v9  ;;  %v314_v17 = vadd.f32 %v312_v12, %v275_v10 }
 0x1db   :  { %v327_v18 = vadd.f32 %v326_v13, %v274_v9  ;;  %v328_v20 = vadd.f32 %v326_v13, %v275_v10 }
 0x1dc   :  { %299 = vst.msk [vmem:[%s511_s5 - $0x6] sm:$0xc0] %vm298_vm3, %v296_v14  ;;  %315 = vst.msk [vmem:[%s511_s5 - $0x3] sm:$0xc0] %vm298_vm3, %v313_v16 }
 0x1dd   :  { %301 = vst.msk [vmem:[%s511_s5 + $0x2] sm:$0x1] %vm300_vm4, %v297_v15  ;;  %316 = vst.msk [vmem:[%s511_s5 + $0x5] sm:$0x1] %vm300_vm4, %v314_v17 }
 0x1de   :  { %329 = vst.msk [vmem:[%s511_s5] sm:$0xc0] %vm298_vm3, %v327_v18 }
 0x1df   :  { %330 = vst.msk [vmem:[%s511_s5 + $0x8] sm:$0x1] %vm300_vm4, %v328_v20 }

</bundles_post_ra>
